<compile_context>
chip_gen: v6e
topology: v6e:2x2x1
jax: 0.10.0
libtpu: 0.0.40
codegen_flags: <defaults>
</compile_context>

<pallas_src>
import jax
import jax.numpy as jnp
from jax import lax
from jax.experimental import pallas as pl
from jax.experimental.pallas import tpu as pltpu

# Fixed module dimensions (Conv2d(3,16,3) -> Linear(16,32) -> Linear(32,8)).
CI = 3      # conv in channels
CO = 16     # conv out channels
F1 = 32     # fc1 out features
F1_IN = 16  # fc1 in features (== conv output width required by the module)
F2 = 8      # fc2 out features
KH = 3      # conv kernel height
KW = 3      # conv kernel width


def _fused_kernel(x_ref, w_ref, b_ref, o_ref):
    # Single MXU pass: (M, 176) bf16 @ (176, 128) bf16 -> f32, + folded bias.
    # Output last dim = 128 -> lane-dense, unmasked stores.
    o_ref[...] = (jnp.dot(x_ref[...], w_ref[...], preferred_element_type=jnp.float32)
                  + b_ref[...]).astype(o_ref.dtype)


def prepare_params(params, w_in):
    """One-time re-layout: fold conv -> fc1 -> fc2 (all affine) into one weight + one bias."""
    conv_w = params["conv_w"]                      # (CO, CI, KH, KW)
    w_out = w_in - KW + 1                          # conv output width
    assert w_out == params["fc1_w"].shape[1], "conv output width must equal fc1.in_features"

    # Banded conv weight: Wc[(ci,kh,w), c, w'] = conv_w[c,ci,kh,w-w'] for 0 <= w-w' < KW.
    ind = (jnp.arange(w_in)[None, :, None]
           == jnp.arange(w_out)[None, None, :] + jnp.arange(KW)[:, None, None]
           ).astype(jnp.float32)                                       # (KW, w_in, w_out)
    wc = jnp.einsum("oihk,kwv->ihwov", conv_w, ind)                    # (CI,KH,w_in,CO,w_out)
    wc = wc.reshape(CI * KH * w_in, CO, w_out)                         # (162, 16, 16)

    # Compose fc2 o fc1 (no activation between them): M[w', o] = sum_j fc1_w[j,w'] * fc2_w[o,j]
    m = params["fc1_w"].T @ params["fc2_w"].T                          # (16, 8)

    # Folded weight: W_total[(ci,kh,w), (c,o)] = sum_w' Wc[.,c,w'] * M[w',o]
    w_tot = jnp.einsum("kcw,wo->kco", wc, m).reshape(CI * KH * w_in, CO * F2)   # (162, 128)
    k_pad = ((w_tot.shape[0] + 15) // 16) * 16                         # 162 -> 176 (bf16 sublanes)
    w_tot = jnp.pad(w_tot, ((0, k_pad - w_tot.shape[0]), (0, 0)))

    # Folded bias: b[c,o] = conv_b[c] * sum_w' M[w',o] + fc2_w @ fc1_b + fc2_b
    b23 = params["fc2_w"] @ params["fc1_b"] + params["fc2_b"]          # (8,)
    b_tot = (params["conv_b"][:, None] * m.sum(0)[None, :]
             + b23[None, :]).reshape(1, CO * F2)                       # (1, 128), cols = (c,o)

    return dict(w=w_tot.astype(jnp.bfloat16), b=b_tot.astype(jnp.float32))


def non_tcast_forward(x, prep):
    # x: (N, CI, H, W) NCHW float32; W - 2 == fc1.in_features is an inherent model constraint.
    N, ci, H, W = x.shape
    assert ci == CI and W - KW + 1 == F1_IN, "NonTcastModel requires CI=3 and W=18"
    Ho = H - KH + 1
    k_pad = prep["w"].shape[0]

    # Row extraction: rows=(n,h), cols=(ci,kh,w) -- 3 shifted slices; XLA fuses this slab into
    # one fusion ahead of the kernel.
    slabs = jnp.stack([x[:, :, kh:kh + Ho, :] for kh in range(KH)], axis=2)  # (N,CI,KH,Ho,W)
    xrows = slabs.transpose(0, 3, 1, 2, 4).reshape(N * Ho, CI * KH * W)      # (N*Ho, 162)
    xrows = jnp.pad(xrows, ((0, 0), (0, k_pad - xrows.shape[1])))            # (N*Ho, 176)
    xrows = xrows.astype(jnp.bfloat16)

    out_cols = pl.pallas_call(
        _fused_kernel,
        out_shape=jax.ShapeDtypeStruct((N * Ho, CO * F2), jnp.float32),
        in_specs=[pl.BlockSpec(memory_space=pltpu.MemorySpace.VMEM)] * 3,
        out_specs=pl.BlockSpec(memory_space=pltpu.MemorySpace.VMEM),
    )(xrows, prep["w"], prep["b"])

    # [(n,h), (c,o)] -> (N, C, Ho, O); tiny 16 KB relayout fused into the surrounding jit.
    return out_cols.reshape(N, Ho, CO, F2).transpose(0, 2, 1, 3)


def reference_forward(x, params):
    # pure-JAX reference mirroring the PyTorch module, for correctness check
    y = lax.conv_general_dilated(x, params["conv_w"], (1, 1), "VALID",
                                 dimension_numbers=("NCHW", "OIHW", "NCHW"))
    y = y + params["conv_b"].reshape(1, CO, 1, 1)
    y = jnp.einsum("nchw,kw->nchk", y, params["fc1_w"]) + params["fc1_b"]
    y = jnp.einsum("nchk,ok->ncho", y, params["fc2_w"]) + params["fc2_b"]
    return y


if __name__ == "__main__":
    key = jax.random.PRNGKey(0)
    ks = jax.random.split(key, 7)
    N, Cin, H, W = 2, 3, 18, 18  # W=18 -> conv output width 16 == fc1.in_features
    x = jax.random.normal(ks[0], (N, Cin, H, W), jnp.float32)
    params = {
        "conv_w": jax.random.normal(ks[1], (CO, CI, KH, KW), jnp.float32) * 0.2,
        "conv_b": jax.random.normal(ks[2], (CO,), jnp.float32) * 0.1,
        "fc1_w": jax.random.normal(ks[3], (F1, F1_IN), jnp.float32) * 0.2,
        "fc1_b": jax.random.normal(ks[4], (F1,), jnp.float32) * 0.1,
        "fc2_w": jax.random.normal(ks[5], (F2, F1), jnp.float32) * 0.2,
        "fc2_b": jax.random.normal(ks[6], (F2,), jnp.float32) * 0.1,
    }

    prep = prepare_params(params, w_in=W)          # one-time weight fold + re-layout
    fwd = jax.jit(non_tcast_forward)

    out = jax.block_until_ready(fwd(x, prep))
    ref = jax.block_until_ready(reference_forward(x, params))

    assert out.shape == (N, CO, H - 2, F2), out.shape
    max_err = float(jnp.max(jnp.abs(out - ref)))
    # bf16 operands with f32 accumulation over K=162 -> expect ~1e-2 max abs error.
    assert jnp.allclose(out, ref, atol=2e-2, rtol=2e-2), max_err
    print("KERNEL_OK")
</pallas_src>

<mosaic_0001>
module attributes {stable_mosaic.version = 11 : i64} {
  func.func @_fused_kernel(%arg0: memref<32x176xbf16, #tpu.memory_space<vmem>>, %arg1: memref<176x128xbf16, #tpu.memory_space<vmem>>, %arg2: memref<1x128xf32, #tpu.memory_space<vmem>>, %arg3: memref<32x128xf32, #tpu.memory_space<vmem>>) attributes {dimension_semantics = [], scalar_prefetch = 0 : i64, scratch_operands = 0 : i64, tpu.core_type = #tpu.core_type<tc>} {
    %c0 = arith.constant 0 : index
    %c0_0 = arith.constant 0 : index
    %0 = vector.load %arg0[%c0, %c0_0] : memref<32x176xbf16, #tpu.memory_space<vmem>>, vector<32x176xbf16>
    %c0_1 = arith.constant 0 : index
    %c0_2 = arith.constant 0 : index
    %1 = vector.load %arg1[%c0_1, %c0_2] : memref<176x128xbf16, #tpu.memory_space<vmem>>, vector<176x128xbf16>
    %cst = arith.constant dense<0.000000e+00> : vector<32x128xf32>
    %2 = tpu.matmul %0, %1, %cst {dimension_numbers = #tpu.dot_dimension_numbers<[1], [0], [0], [1], [0, 0, 1, 1], [], []>} : vector<32x176xbf16>, vector<176x128xbf16>, vector<32x128xf32> -> vector<32x128xf32>
    %c0_3 = arith.constant 0 : index
    %c0_4 = arith.constant 0 : index
    %3 = vector.load %arg2[%c0_3, %c0_4] : memref<1x128xf32, #tpu.memory_space<vmem>>, vector<1x128xf32>
    %4 = vector.broadcast %3 : vector<1x128xf32> to vector<32x128xf32>
    %5 = arith.addf %2, %4 : vector<32x128xf32>
    %c0_5 = arith.constant 0 : index
    %c0_6 = arith.constant 0 : index
    %6 = vector.load %arg3[%c0_5, %c0_6] : memref<32x128xf32, #tpu.memory_space<vmem>>, vector<32x128xf32>
    tpu.vector_store %arg3[%c0_5, %c0_6], %5 {strides = array<i32>} : memref<32x128xf32, #tpu.memory_space<vmem>>, vector<32x128xf32>,
    return
  }
}

</mosaic_0001>

<bundles_post_ra>
// kernel: non_tcast_forward.1
= control target key start
LH: loop header
LB: loop body
LE: loop exit
PB: predicated region body
PF: predicated region fallthrough
CT: control target
= control target key end

     0   :  { %v254_v0 = vmov 0   ;;  %vm132_vm0 = vcmask 392192   ;;  %s335_s1 = inlined_call_operand.vmem [shape: bf16[176,128], index: 1, kind: input, shape index: {}]   ;;  %s336_s0 = inlined_call_operand.vmem [shape: bf16[32,176], index: 0, kind: input, shape index: {}]   ;;  %s337_s2 = inlined_call_operand.vmem [shape: f32[1,128], index: 2, kind: input, shape index: {}]   ;;  %s338_s3 = inlined_call_operand.vmem [shape: f32[32,128], index: 3, kind: output, shape index: {}]  }
   0x1   :  { %139 = vmatprep.subr.bf16.mxu0 %v254_v0  ;;  %214 = vmatprep.subr.bf16.mxu1 %v254_v0  ;;  %v237_v1 = vld [vmem:[%s335_s1 + $0x38] sm:$0xff]   ;;  %v238_v2 = vld [vmem:[%s335_s1 + $0x30] sm:$0xff]   ;;  %v239_v3 = vld [vmem:[%s335_s1 + $0x28] sm:$0xff]  }
   0x2   :  { %140 = vmatpush1.bf16.msra.mxu0 %v237_v1  ;;  %225 = vmatpush1.bf16.msra.mxu1 %v237_v1  ;;  %v240_v4 = vld [vmem:[%s335_s1 + $0x20] sm:$0xff]   ;;  %v253_v6 = vld [vmem:[%s336_s0 + $0x14] ss:$8 sps:$4 sm:$0xff]   ;;  %v243_v9 = vld [vmem:[%s335_s1 + $0x8] sm:$0xff]  }
   0x3   :  { %141 = vmatprep.subr.bf16.mxu0 %v254_v0  ;;  %215 = vmatprep.subr.bf16.mxu1 %v254_v0  ;;  %v250_v5 = vld [vmem:[%s336_s0 + $0x4] ss:$8 sps:$4 sm:$0xff]   ;;  %v241_v7 = vld [vmem:[%s335_s1 + $0x18] sm:$0xff]   ;;  %v242_v8 = vld [vmem:[%s335_s1 + $0x10] sm:$0xff]  }
   0x4   :  { %212 = vmatprep.mubr.msk.bf16.mxu0 %vm132_vm0, %v250_v5  ;;  %213 = vmatprep.mubr.msk.bf16.mxu1 %vm132_vm0, %v253_v6  ;;  %v244_v10 = vld [vmem:[%s335_s1] sm:$0xff]   ;;  %v245_v11 = vld [vmem:[%s335_s1 + $0x50] sm:$0xff]   ;;  %v246_v12 = vld [vmem:[%s335_s1 + $0x48] sm:$0xff]  }
   0x5   :  { %v247_v13 = vld [vmem:[%s335_s1 + $0x40] sm:$0xff]   ;;  %v251_v15 = vld [vmem:[%s336_s0 + $0x10] ss:$8 sps:$4 sm:$0xff]  }
   0x6   :  { %142 = vmatpush1.bf16.msra.mxu0 %v238_v2  ;;  %226 = vmatpush1.bf16.msra.mxu1 %v238_v2  ;;  %v248_v14 = vld [vmem:[%s336_s0] ss:$8 sps:$4 sm:$0xff]  }
   0x7   :  { %143 = vmatprep.subr.bf16.mxu0 %v254_v0  ;;  %216 = vmatprep.subr.bf16.mxu1 %v254_v0  ;;  %v196_v16 = vld [vmem:[%s337_s2] ss:$0 sm:$0xff] }
   0xa   :  { %144 = vmatpush1.bf16.msra.mxu0 %v239_v3  ;;  %227 = vmatpush1.bf16.msra.mxu1 %v239_v3 }
   0xb   :  { %145 = vmatprep.subr.bf16.mxu0 %v254_v0  ;;  %217 = vmatprep.subr.bf16.mxu1 %v254_v0 }
   0xe   :  { %146 = vmatpush1.bf16.msra.mxu0 %v240_v4  ;;  %228 = vmatpush1.bf16.msra.mxu1 %v240_v4 }
   0xf   :  { %147 = vmatprep.subr.bf16.mxu0 %v254_v0  ;;  %218 = vmatprep.subr.bf16.mxu1 %v254_v0 }
  0x12   :  { %148 = vmatpush1.bf16.msra.mxu0 %v241_v7  ;;  %229 = vmatpush1.bf16.msra.mxu1 %v241_v7 }
  0x13   :  { %149 = vmatprep.subr.bf16.mxu0 %v254_v0  ;;  %219 = vmatprep.subr.bf16.mxu1 %v254_v0 }
  0x16   :  { %150 = vmatpush1.bf16.msra.mxu0 %v242_v8  ;;  %230 = vmatpush1.bf16.msra.mxu1 %v242_v8 }
  0x17   :  { %151 = vmatprep.subr.bf16.mxu0 %v254_v0  ;;  %220 = vmatprep.subr.bf16.mxu1 %v254_v0 }
  0x1a   :  { %152 = vmatpush1.bf16.msra.mxu0 %v243_v9  ;;  %231 = vmatpush1.bf16.msra.mxu1 %v243_v9 }
  0x1b   :  { %153 = vmatprep.subr.bf16.mxu0 %v254_v0  ;;  %221 = vmatprep.subr.bf16.mxu1 %v254_v0 }
  0x1e   :  { %154 = vmatpush1.bf16.msra.mxu0 %v244_v10  ;;  %232 = vmatpush1.bf16.msra.mxu1 %v244_v10 }
  0x1f   :  { %165 = vmatprep.subr.bf16.mxu0 %v254_v0  ;;  %222 = vmatprep.subr.bf16.mxu1 %v254_v0 }
  0x22   :  { %166 = vmatpush2.bf16.msra.mxu0 %v245_v11  ;;  %233 = vmatpush2.bf16.msra.mxu1 %v245_v11 }
  0x23   :  { %167 = vmatprep.subr.bf16.mxu0 %v254_v0  ;;  %223 = vmatprep.subr.bf16.mxu1 %v254_v0 }
  0x26   :  { %168 = vmatpush2.bf16.msra.mxu0 %v246_v12  ;;  %234 = vmatpush2.bf16.msra.mxu1 %v246_v12 }
  0x27   :  { %169 = vmatprep.subr.bf16.mxu0 %v254_v0  ;;  %224 = vmatprep.subr.bf16.mxu1 %v254_v0 }
  0x2a   :  { %170 = vmatpush2.bf16.msra.mxu0 %v247_v13  ;;  %235 = vmatpush2.bf16.msra.mxu1 %v247_v13 }
  0x2d   :  { %172 = vmatmul.mubr.bf16.vlgmr.msra.gmra.mxu0 %v248_v14  ;;  %180 = vmatmul.mubr.bf16.vlgmr.msra.gmra.mxu1 %v251_v15 }
  0xed   :  { %v173_v17 = vpop.f32.mrf.mxu0  ;;  %v181_v18 = vpop.f32.mrf.mxu1 }
  0xee   :  { %v174_v19 = vadd.f32 %v196_v16, %v173_v17  ;;  %v182_v20 = vadd.f32 %v196_v16, %v181_v18 }
  0xef   :  { %v175_v21 = vpop.f32.mrf.mxu0  ;;  %v183_v22 = vpop.f32.mrf.mxu1 }
  0xf0   :  { %188 = vst [vmem:[%s338_s3] sm:$0xff] %v174_v19  ;;  %190 = vst [vmem:[%s338_s3 + $0x10] sm:$0xff] %v182_v20 }
  0xf1   :  { %v176_v23 = vpop.f32.mrf.mxu0  ;;  %v184_v24 = vpop.f32.mrf.mxu1 }
  0xf2   :  { %v177_v25 = vadd.f32 %v196_v16, %v176_v23  ;;  %v185_v26 = vadd.f32 %v196_v16, %v184_v24 }
  0xf3   :  { %v178_v27 = vpop.f32.mrf.mxu0  ;;  %v186_v28 = vpop.f32.mrf.mxu1 }
  0xf4   :  { %189 = vst [vmem:[%s338_s3 + $0x8] sm:$0xff] %v177_v25  ;;  %191 = vst [vmem:[%s338_s3 + $0x18] sm:$0xff] %v185_v26 }

</bundles_post_ra>
